<compile_context>
chip_gen: v7x
topology: tpu7x:2x2x1
jax: 0.10.0
libtpu: 0.0.40
codegen_flags: <defaults>
</compile_context>

<pallas_src>
import functools

import jax
import jax.numpy as jnp
from jax.experimental import pallas as pl
from jax.experimental.pallas import tpu as pltpu

_SUBLANE = 8
_LANE = 128
_BLOCK_BYTES = 4 * 1024 * 1024      # ~4 MiB per streamed block
_VMEM_LIMIT = 32 * 1024 * 1024      # explicit scoped-VMEM limit (v7x-safe)
_MAX_TILE_HW = 8192                 # lane-axis tile cap (multiple of 128)


def _pick_tiles(n_rows, hw, itemsize):
    """Largest legal (sublane, lane) tile that keeps the working set in budget."""
    # Lane (last) axis: full extent if small (block == full dim is always legal),
    # otherwise a 128-aligned tile; a partial last block is masked in the kernel.
    tile_hw = hw if hw <= _MAX_TILE_HW else _MAX_TILE_HW

    max_rows = max(_SUBLANE, _BLOCK_BYTES // (itemsize * tile_hw))
    if n_rows <= max_rows:
        tile_r = n_rows                               # full dim -> always legal
    else:
        tile_r = (max_rows // _SUBLANE) * _SUBLANE    # 8-aligned, partial last block OK
    return tile_r, tile_hw


def _stats_kernel(x_ref, sum_ref, sq_ref, *, hw_total, tile_hw, mask_lanes):
    """Per-row (= per (n, c) pair) sum and sum-of-squares, accumulated over lanes."""
    @pl.when(pl.program_id(1) == 0)
    def _():
        sum_ref[...] = jnp.zeros_like(sum_ref)
        sq_ref[...] = jnp.zeros_like(sq_ref)

    x = x_ref[...].astype(jnp.float32)
    if mask_lanes:  # static flag: only emitted when HW is not a multiple of tile_hw
        lane = jax.lax.broadcasted_iota(jnp.int32, x.shape, 1)
        lane = lane + pl.program_id(1) * tile_hw
        x = jnp.where(lane < hw_total, x, 0.0)

    sum_ref[...] += jnp.sum(x, axis=1, keepdims=True)
    sq_ref[...] += jnp.sum(x * x, axis=1, keepdims=True)


def _apply_kernel(x_ref, scale_ref, shift_ref, o_ref):
    """out = sigmoid(x * scale + shift) * x   (scale/shift broadcast over lanes)."""
    x = x_ref[...].astype(jnp.float32)
    z = x * scale_ref[...] + shift_ref[...]
    o_ref[...] = (jax.nn.sigmoid(z) * x).astype(o_ref.dtype)


def channel_att(x_nchw, gamma, beta, *, eps=1e-5):
    n, c, h, w = x_nchw.shape
    hw = h * w
    rows = n * c
    x2d = x_nchw.reshape(rows, hw)          # free reshape: contiguous NCHW merge

    tile_r, tile_hw = _pick_tiles(rows, hw, x2d.dtype.itemsize)
    nr = pl.cdiv(rows, tile_r)
    nj = pl.cdiv(hw, tile_hw)
    mask_lanes = (nj > 1) and (hw % tile_hw != 0)

    # ---- pass 1: per-row batch statistics (reduction over the HW grid axis) ----
    row_sums, row_sqs = pl.pallas_call(
        functools.partial(_stats_kernel, hw_total=hw, tile_hw=tile_hw,
                          mask_lanes=mask_lanes),
        out_shape=(jax.ShapeDtypeStruct((rows, 1), jnp.float32),
                   jax.ShapeDtypeStruct((rows, 1), jnp.float32)),
        grid_spec=pltpu.PrefetchScalarGridSpec(
            num_scalar_prefetch=0,
            grid=(nr, nj),
            in_specs=[pl.BlockSpec((tile_r, tile_hw), lambda i, j: (i, j))],
            out_specs=(pl.BlockSpec((tile_r, 1), lambda i, j: (i, 0)),
                       pl.BlockSpec((tile_r, 1), lambda i, j: (i, 0)))),
        compiler_params=pltpu.CompilerParams(
            dimension_semantics=("parallel", "arbitrary"),
            vmem_limit_bytes=_VMEM_LIMIT),
    )(x2d)

    # ---- tiny per-channel finalize in plain JAX (only C / N*C elements) --------
    m_total = jnp.float32(n * hw)
    ch_sum = row_sums.reshape(n, c).sum(axis=0)
    ch_sq = row_sqs.reshape(n, c).sum(axis=0)
    mean = ch_sum / m_total
    var = jnp.maximum(ch_sq / m_total - mean * mean, 0.0)   # biased (train-mode BN)
    inv = jax.lax.rsqrt(var + eps)
    g = gamma.astype(jnp.float32)
    b = beta.astype(jnp.float32)
    w_bn = jnp.abs(g) / jnp.sum(jnp.abs(g))
    scale_c = inv * g * w_bn                                # z = x*scale + shift
    shift_c = (b - mean * inv * g) * w_bn
    scale_rows = jnp.tile(scale_c, n).reshape(rows, 1)      # row r -> channel r % C
    shift_rows = jnp.tile(shift_c, n).reshape(rows, 1)

    # ---- pass 2: streaming elementwise gate (lane-dense blocks) ----------------
    out2d = pl.pallas_call(
        _apply_kernel,
        out_shape=jax.ShapeDtypeStruct((rows, hw), x2d.dtype),
        grid_spec=pltpu.PrefetchScalarGridSpec(
            num_scalar_prefetch=0,
            grid=(nr, nj),
            in_specs=[pl.BlockSpec((tile_r, tile_hw), lambda i, j: (i, j)),
                      pl.BlockSpec((tile_r, 1), lambda i, j: (i, 0)),
                      pl.BlockSpec((tile_r, 1), lambda i, j: (i, 0))],
            out_specs=pl.BlockSpec((tile_r, tile_hw), lambda i, j: (i, j))),
        compiler_params=pltpu.CompilerParams(
            dimension_semantics=("parallel", "parallel"),
            vmem_limit_bytes=_VMEM_LIMIT),
    )(x2d, scale_rows, shift_rows)

    return out2d.reshape(n, c, h, w)        # free reshape back to NCHW


@jax.jit
def nam_attention(x_nchw, gamma, beta):
    # NAMAttention default: no_spatial=True -> only Channel_Att is applied.
    # TODO(synk): Spatial_Att branch (no_spatial=False) not implemented here.
    return channel_att(x_nchw, gamma, beta)


def _reference(x, gamma, beta, eps=1e-5):
    """Pure-JAX reference for the PyTorch forward (training-mode BN)."""
    xf = x.astype(jnp.float32)
    mean = jnp.mean(xf, axis=(0, 2, 3), keepdims=True)
    var = jnp.mean((xf - mean) ** 2, axis=(0, 2, 3), keepdims=True)
    g = gamma.reshape(1, -1, 1, 1)
    b = beta.reshape(1, -1, 1, 1)
    y = (xf - mean) * jax.lax.rsqrt(var + eps) * g + b
    w_bn = jnp.abs(g) / jnp.sum(jnp.abs(gamma))
    z = y * w_bn
    return (jax.nn.sigmoid(z) * xf).astype(x.dtype)


if __name__ == "__main__":
    key = jax.random.PRNGKey(0)
    kx, kg, kb = jax.random.split(key, 3)

    N, C, H, W = 2, 4, 16, 16
    x = jax.random.normal(kx, (N, C, H, W), dtype=jnp.float32)
    # Deterministic, non-trivial BN affine params (PyTorch default would be
    # gamma=1, beta=0; random values make the channel re-weighting meaningful).
    gamma = jax.random.normal(kg, (C,), dtype=jnp.float32) + 1.5
    beta = 0.1 * jax.random.normal(kb, (C,), dtype=jnp.float32)

    out = nam_attention(x, gamma, beta)
    out = jax.block_until_ready(out)

    ref = _reference(x, gamma, beta)
    assert out.shape == x.shape and out.dtype == x.dtype
    assert jnp.allclose(out, ref, atol=1e-5, rtol=1e-5), "mismatch vs reference"
    print("KERNEL_OK")
</pallas_src>

<mosaic_0001>
module attributes {stable_mosaic.version = 11 : i64} {
  func.func @_stats_kernel(%arg0: i32, %arg1: i32, %arg2: memref<8x256xf32, #tpu.memory_space<vmem>>, %arg3: memref<8x1xf32, #tpu.memory_space<vmem>>, %arg4: memref<8x1xf32, #tpu.memory_space<vmem>>) attributes {dimension_semantics = [#tpu.dimension_semantics<parallel>, #tpu.dimension_semantics<arbitrary>], iteration_bounds = array<i64: 1, 1>, scalar_prefetch = 0 : i64, scratch_operands = 0 : i64, tpu.core_type = #tpu.core_type<tc>, window_params = [{transform_indices = @transform_0, window_bounds = array<i64: 8, 256>}, {transform_indices = @transform_1, window_bounds = array<i64: 8, 1>}, {transform_indices = @transform_2, window_bounds = array<i64: 8, 1>}]} {
    %c0_i32 = arith.constant 0 : i32
    %0 = arith.cmpi eq, %arg1, %c0_i32 : i32
    %1 = arith.extui %0 : i1 to i32
    %c0_i32_0 = arith.constant 0 : i32
    %2 = arith.cmpi ne, %1, %c0_i32_0 : i32
    scf.if %2 {
      %cst_11 = arith.constant 0.000000e+00 : f32
      %15 = vector.broadcast %cst_11 : f32 to vector<8x1xf32>
      %c0_12 = arith.constant 0 : index
      %c0_13 = arith.constant 0 : index
      %16 = vector.load %arg3[%c0_12, %c0_13] : memref<8x1xf32, #tpu.memory_space<vmem>>, vector<8x1xf32>
      tpu.vector_store %arg3[%c0_12, %c0_13], %15 {strides = array<i32>} : memref<8x1xf32, #tpu.memory_space<vmem>>, vector<8x1xf32>,
      %cst_14 = arith.constant 0.000000e+00 : f32
      %17 = vector.broadcast %cst_14 : f32 to vector<8x1xf32>
      %c0_15 = arith.constant 0 : index
      %c0_16 = arith.constant 0 : index
      %18 = vector.load %arg4[%c0_15, %c0_16] : memref<8x1xf32, #tpu.memory_space<vmem>>, vector<8x1xf32>
      tpu.vector_store %arg4[%c0_15, %c0_16], %17 {strides = array<i32>} : memref<8x1xf32, #tpu.memory_space<vmem>>, vector<8x1xf32>,
    } else {
    }
    %c0 = arith.constant 0 : index
    %c0_1 = arith.constant 0 : index
    %3 = vector.load %arg2[%c0, %c0_1] : memref<8x256xf32, #tpu.memory_space<vmem>>, vector<8x256xf32>
    %c0_2 = arith.constant 0 : index
    %c0_3 = arith.constant 0 : index
    %4 = vector.load %arg3[%c0_2, %c0_3] : memref<8x1xf32, #tpu.memory_space<vmem>>, vector<8x1xf32>
    %cst = arith.constant dense<0.000000e+00> : vector<8xf32>
    %5 = vector.multi_reduction <add>, %3, %cst [1] : vector<8x256xf32> to vector<8xf32>
    %6 = vector.shape_cast %5 : vector<8xf32> to vector<8x1xf32>
    %7 = arith.addf %4, %6 : vector<8x1xf32>
    %c0_4 = arith.constant 0 : index
    %c0_5 = arith.constant 0 : index
    %8 = vector.load %arg3[%c0_4, %c0_5] : memref<8x1xf32, #tpu.memory_space<vmem>>, vector<8x1xf32>
    tpu.vector_store %arg3[%c0_4, %c0_5], %7 {strides = array<i32>} : memref<8x1xf32, #tpu.memory_space<vmem>>, vector<8x1xf32>,
    %c0_6 = arith.constant 0 : index
    %c0_7 = arith.constant 0 : index
    %9 = vector.load %arg4[%c0_6, %c0_7] : memref<8x1xf32, #tpu.memory_space<vmem>>, vector<8x1xf32>
    %10 = arith.mulf %3, %3 : vector<8x256xf32>
    %cst_8 = arith.constant dense<0.000000e+00> : vector<8xf32>
    %11 = vector.multi_reduction <add>, %10, %cst_8 [1] : vector<8x256xf32> to vector<8xf32>
    %12 = vector.shape_cast %11 : vector<8xf32> to vector<8x1xf32>
    %13 = arith.addf %9, %12 : vector<8x1xf32>
    %c0_9 = arith.constant 0 : index
    %c0_10 = arith.constant 0 : index
    %14 = vector.load %arg4[%c0_9, %c0_10] : memref<8x1xf32, #tpu.memory_space<vmem>>, vector<8x1xf32>
    tpu.vector_store %arg4[%c0_9, %c0_10], %13 {strides = array<i32>} : memref<8x1xf32, #tpu.memory_space<vmem>>, vector<8x1xf32>,
    return
  }
  func.func @transform_0(%arg0: i32, %arg1: i32) -> (i32, i32) {
    %c0_i32 = arith.constant 0 : i32
    return %arg0, %arg1 : i32, i32
  }
  func.func @transform_1(%arg0: i32, %arg1: i32) -> (i32, i32) {
    %c0_i32 = arith.constant 0 : i32
    %c0_i32_0 = arith.constant 0 : i32
    return %arg0, %c0_i32 : i32, i32
  }
  func.func @transform_2(%arg0: i32, %arg1: i32) -> (i32, i32) {
    %c0_i32 = arith.constant 0 : i32
    %c0_i32_0 = arith.constant 0 : i32
    return %arg0, %c0_i32 : i32, i32
  }
}

module attributes {stable_mosaic.version = 11 : i64} {
  func.func @_apply_kernel(%arg0: i32, %arg1: i32, %arg2: memref<8x256xf32, #tpu.memory_space<vmem>>, %arg3: memref<8x1xf32, #tpu.memory_space<vmem>>, %arg4: memref<8x1xf32, #tpu.memory_space<vmem>>, %arg5: memref<8x256xf32, #tpu.memory_space<vmem>>) attributes {dimension_semantics = [#tpu.dimension_semantics<parallel>, #tpu.dimension_semantics<parallel>], iteration_bounds = array<i64: 1, 1>, scalar_prefetch = 0 : i64, scratch_operands = 0 : i64, tpu.core_type = #tpu.core_type<tc>, window_params = [{transform_indices = @transform_0, window_bounds = array<i64: 8, 256>}, {transform_indices = @transform_1, window_bounds = array<i64: 8, 1>}, {transform_indices = @transform_2, window_bounds = array<i64: 8, 1>}, {transform_indices = @transform_3, window_bounds = array<i64: 8, 256>}]} {
    %c0 = arith.constant 0 : index
    %c0_0 = arith.constant 0 : index
    %0 = vector.load %arg2[%c0, %c0_0] : memref<8x256xf32, #tpu.memory_space<vmem>>, vector<8x256xf32>
    %c0_1 = arith.constant 0 : index
    %c0_2 = arith.constant 0 : index
    %1 = vector.load %arg3[%c0_1, %c0_2] : memref<8x1xf32, #tpu.memory_space<vmem>>, vector<8x1xf32>
    %2 = vector.broadcast %1 : vector<8x1xf32> to vector<8x256xf32>
    %3 = arith.mulf %0, %2 : vector<8x256xf32>
    %c0_3 = arith.constant 0 : index
    %c0_4 = arith.constant 0 : index
    %4 = vector.load %arg4[%c0_3, %c0_4] : memref<8x1xf32, #tpu.memory_space<vmem>>, vector<8x1xf32>
    %5 = vector.broadcast %4 : vector<8x1xf32> to vector<8x256xf32>
    %6 = arith.addf %3, %5 : vector<8x256xf32>
    %7 = arith.negf %6 : vector<8x256xf32>
    %8 = math.exp %7 : vector<8x256xf32>
    %cst = arith.constant 1.000000e+00 : f32
    %9 = vector.broadcast %cst : f32 to vector<8x256xf32>
    %10 = arith.addf %9, %8 : vector<8x256xf32>
    %11 = arith.divf %9, %10 : vector<8x256xf32>
    %12 = arith.mulf %11, %0 : vector<8x256xf32>
    %c0_5 = arith.constant 0 : index
    %c0_6 = arith.constant 0 : index
    %13 = vector.load %arg5[%c0_5, %c0_6] : memref<8x256xf32, #tpu.memory_space<vmem>>, vector<8x256xf32>
    tpu.vector_store %arg5[%c0_5, %c0_6], %12 {strides = array<i32>} : memref<8x256xf32, #tpu.memory_space<vmem>>, vector<8x256xf32>,
    return
  }
  func.func @transform_0(%arg0: i32, %arg1: i32) -> (i32, i32) {
    %c0_i32 = arith.constant 0 : i32
    return %arg0, %arg1 : i32, i32
  }
  func.func @transform_1(%arg0: i32, %arg1: i32) -> (i32, i32) {
    %c0_i32 = arith.constant 0 : i32
    %c0_i32_0 = arith.constant 0 : i32
    return %arg0, %c0_i32 : i32, i32
  }
  func.func @transform_2(%arg0: i32, %arg1: i32) -> (i32, i32) {
    %c0_i32 = arith.constant 0 : i32
    %c0_i32_0 = arith.constant 0 : i32
    return %arg0, %c0_i32 : i32, i32
  }
  func.func @transform_3(%arg0: i32, %arg1: i32) -> (i32, i32) {
    %c0_i32 = arith.constant 0 : i32
    return %arg0, %arg1 : i32, i32
  }
}

</mosaic_0001>

<bundles_post_ra>
// kernel: tile.18
= control target key start
LH: loop header
LB: loop body
LE: loop exit
PB: predicated region body
PF: predicated region fallthrough
CT: control target
= control target key end

     0   :  { %s22_s0 = inlined_call_operand.vmem [shape: f32[4], index: 0, kind: input, shape index: {}]   ;;  %s23_s1 = inlined_call_operand.vmem [shape: f32[2,4], index: 1, kind: output, shape index: {}]  }
   0x1   :  { %v4_v0 = vld [vmem:[%s22_s0] ss:$0 sm:$0xff] }
   0x2   :  { %5 = vst [vmem:[%s23_s1] sm:$0x3] %v4_v0 }

// kernel: tile.0
= control target key start
LH: loop header
LB: loop body
LE: loop exit
PB: predicated region body
PF: predicated region fallthrough
CT: control target
= control target key end

     0   :  { %s34_s8 = smov 125   ;;  %vm7_vm0 = vcmask 7168   ;;  %s35_s11 = smov 126   ;;  %s61_s0 = inlined_call_operand.vmem [shape: f32[2,4], index: 0, kind: input, shape index: {}]   ;;  %s62_s1 = inlined_call_operand.vmem [shape: f32[8,1], index: 1, kind: output, shape index: {}]  }
   0x1   :  { %v4_v0 = vld [vmem:[%s61_s0] sm:$0x3]  ;;  %s33_s0 = smov 127  }
   0x2   :  { %5 = vst [vmem:[#allocation0] sm:$0x3] %v4_v0 }
   0x9   :  { %v9_v1 = vld [vmem:[#allocation0] sm:$0x3]  }
   0xa   :  { %v21_v2 = vld [vmem:[#allocation0] sm:$0x3]   ;;  %10 = vrot.lane.b32.xlu0 %v9_v1, %s33_s0 }
   0xb   :  { %22 = vrot.lane.b32.xlu1 %v21_v2, %s34_s8  ;;  %v6_v3 = vld [vmem:[#allocation0] sm:$0x3]  }
   0xc   :  { %v15_v4 = vld [vmem:[#allocation0] sm:$0x3]   ;;  %8 = vst.msk [vmem:[%s62_s1] ss:$4 sm:$0x3] %vm7_vm0, %v6_v3  }
   0xe   :  { %16 = vrot.lane.b32.xlu0 %v15_v4, %s35_s11 }
  0x7c   :  { %v11_v5 = vpop.permute.xlu0 %10  }
  0x7d   :  { %v23_v6 = vpop.permute.xlu1 %22   ;;  %27 = vst.msk [vmem:[%s62_s1 + $0x1] ss:$4 sm:$0x3] %vm7_vm0, %v11_v5  }
  0x7e   :  { %29 = vst.msk [vmem:[%s62_s1 + $0x3] ss:$4 sm:$0x3] %vm7_vm0, %v23_v6  }
  0x80   :  { %v17_v7 = vpop.permute.xlu0 %16  }
  0x81   :  { %28 = vst.msk [vmem:[%s62_s1 + $0x2] ss:$4 sm:$0x3] %vm7_vm0, %v17_v7  }

// kernel: nam_attention.2
= control target key start
LH: loop header
LB: loop body
LE: loop exit
PB: predicated region body
PF: predicated region fallthrough
CT: control target
= control target key end

     0   :  { %vm14_vm0 = vcmask 7168   ;;  %v43_v2 = vmov 0.0   ;;  %s87_s0 = inlined_call_operand.vmem [shape: f32[8,256], index: 0, kind: input, shape index: {}]   ;;  %s88_s1 = inlined_call_operand.vmem [shape: f32[8,1], index: 1, kind: output, shape index: {0}]   ;;  %s89_s2 = inlined_call_operand.vmem [shape: f32[8,1], index: 2, kind: output, shape index: {1}]  }
   0x1   :  { %v17_v0 = vld [vmem:[%s87_s0] sm:$0xff]  ;;  %v18_v1 = vld [vmem:[%s87_s0 + $0x8] sm:$0xff]  ;;  %15 = vst.msk [vmem:[%s88_s1] sm:$0xff] %vm14_vm0, %v43_v2  ;;  %16 = vst.msk [vmem:[%s89_s2] sm:$0xff] %vm14_vm0, %v43_v2 }
   0x2   :  { %v20_v3 = vadd.f32 %v18_v1, %v17_v0  ;;  %v27_v4 = vmul.f32 %v17_v0, %v17_v0  ;;  %v28_v5 = vmul.f32 %v18_v1, %v18_v1 }
   0x4   :  { %21 = vadd.xlane.f32.xlu0 %v20_v3  ;;  %v29_v6 = vadd.f32 %v28_v5, %v27_v4 }
   0x8   :  { %30 = vadd.xlane.f32.xlu0 %v29_v6  ;;  %v19_v7 = vld [vmem:[%s88_s1] sm:$0xff] }
   0x9   :  { %v26_v10 = vld [vmem:[%s89_s2] sm:$0xff] }
  0x91   :  { %v22_v8 = vpop.xlane.xlu0 %21 }
  0x92   :  { %v23_v9 = vadd.f32 %v22_v8, %v19_v7 }
  0x94   :  { %25 = vst.msk [vmem:[%s88_s1] sm:$0xff] %vm14_vm0, %v23_v9 }
  0x95   :  { %v31_v11 = vpop.xlane.xlu0 %30 }
  0x96   :  { %v32_v12 = vadd.f32 %v31_v11, %v26_v10 }
  0x98   :  { %33 = vst.msk [vmem:[%s89_s2] sm:$0xff] %vm14_vm0, %v32_v12 }

// kernel: nam_attention.3
= control target key start
LH: loop header
LB: loop body
LE: loop exit
PB: predicated region body
PF: predicated region fallthrough
CT: control target
= control target key end

     0   :  { %v64_v0 = vmov 0   ;;  %s103_s1 = inlined_call_operand.vmem [shape: f32[8,1], index: 1, kind: input, shape index: {}]   ;;  %s104_s2 = inlined_call_operand.vmem [shape: f32[8,1], index: 2, kind: input, shape index: {}]   ;;  %s105_s0 = inlined_call_operand.vmem [shape: f32[8,256], index: 0, kind: input, shape index: {}]   ;;  %s106_s3 = inlined_call_operand.vmem [shape: f32[8,256], index: 3, kind: output, shape index: {}]  }
   0x1   :  { %55 = vset.pattern.permute.xlu0 %v64_v0  ;;  %v16_v1 = vld [vmem:[%s103_s1] sm:$0xff]  ;;  %v15_v5 = vld [vmem:[%s105_s0 + $0x8] sm:$0xff] }
   0x2   :  { %19 = vperm.xlu0 %55, %v16_v1   ;;  %v24_v2 = vld [vmem:[%s104_s2] sm:$0xff] }
   0x3   :  { %v14_v4 = vld [vmem:[%s105_s0] sm:$0xff] }
   0x6   :  { %27 = vperm.xlu0 %55, %v24_v2  }
  0x81   :  { %v20_v3 = vpop.permute.xlu0 %19 }
  0x82   :  { %v22_v6 = vmul.f32 %v20_v3, %v14_v4  ;;  %v23_v7 = vmul.f32 %v20_v3, %v15_v5 }
  0x85   :  { %v28_v8 = vpop.permute.xlu0 %27 }
  0x86   :  { %v30_v9 = vadd.f32 %v28_v8, %v22_v6  ;;  %v31_v10 = vadd.f32 %v28_v8, %v23_v7 }
  0x88   :  { %v52_v11 = vmul.f32 -1.442695, %v30_v9  ;;  %v53_v12 = vmul.f32 -1.442695, %v31_v10 }
  0x8a   :  { %56 = vpow2.f32 %v52_v11 }
  0x8b   :  { %58 = vpow2.f32 %v53_v12 }
  0x94   :  { %v57_v13 = vpop.eup %56 }
  0x95   :  { %v59_v14 = vpop.eup %58  ;;  %v38_v15 = vadd.f32 1.0, %v57_v13 }
  0x96   :  { %v39_v16 = vadd.f32 1.0, %v59_v14 }
  0x97   :  { %60 = vrcp.f32 %v38_v15 }
  0x98   :  { %62 = vrcp.f32 %v39_v16 }
  0xa1   :  { %v61_v17 = vpop.eup %60 }
  0xa2   :  { %v63_v18 = vpop.eup %62  ;;  %v44_v19 = vmul.f32 %v61_v17, %v14_v4 }
  0xa3   :  { %v45_v20 = vmul.f32 %v63_v18, %v15_v5 }
  0xa4   :  { %46 = vst [vmem:[%s106_s3] sm:$0xff] %v44_v19 }
  0xa5   :  { %47 = vst [vmem:[%s106_s3 + $0x8] sm:$0xff] %v45_v20 }

</bundles_post_ra>
